<compile_context>
chip_gen: v7x
topology: tpu7x:2x2x1
jax: 0.10.0
libtpu: 0.0.40
codegen_flags: <defaults>
</compile_context>

<pallas_src>
import math

import jax
import jax.numpy as jnp
from jax.experimental import pallas as pl
from jax.experimental.pallas import tpu as pltpu


def _gaussian_kernel_2d(kernel_size: int, sigma: float, channels: int) -> jnp.ndarray:
    """Replicates GaussianBlur._gaussian_kernel -> shape (channels, 1, K, K)."""
    coords = jnp.arange(kernel_size, dtype=jnp.float32)
    x_grid = jnp.tile(coords[None, :], (kernel_size, 1))
    y_grid = x_grid.T
    mean = (kernel_size - 1) / 2.0
    variance = float(sigma) ** 2.0
    gk = (1.0 / (2.0 * math.pi * variance)) * jnp.exp(
        -((x_grid - mean) ** 2 + (y_grid - mean) ** 2) / (2.0 * variance)
    )
    gk = gk / jnp.sum(gk)
    return jnp.broadcast_to(gk[None, None, :, :], (channels, 1, kernel_size, kernel_size))


def _gaussian_taps_1d(kernel_size: int, sigma: float) -> list[float]:
    """1-D separable taps; outer(w1d, w1d) == the module's normalized 2-D kernel."""
    mean = (kernel_size - 1) / 2.0
    var = float(sigma) ** 2.0
    g = [math.exp(-((i - mean) ** 2) / (2.0 * var)) for i in range(kernel_size)]
    s = sum(g)
    return [v / s for v in g]


def gaussian_blur_pallas(x: jnp.ndarray, kernel_size: int, sigma: float) -> jnp.ndarray:
    """x: (N, C, H, W) f32 -> 'same'-padded depthwise Gaussian blur."""
    N, C, H, W = x.shape
    K = int(kernel_size)
    assert K % 2 == 1, "'same' output requires odd kernel_size (as in the module)"
    p = (K - 1) // 2
    P = N * C
    HW = H * W
    PAD = p * W                              # p whole zero rows on each side (flat layout)
    w1d = _gaussian_taps_1d(K, sigma)        # baked as Python float constants

    x_flat = x.reshape(P, HW)                # contiguous -> free reshape; lane-dense (last dim 256)

    def kernel(x_ref, o_ref, buf_ref):
        # Fused zero padding: flat plane with p zero rows on each side in VMEM scratch.
        buf_ref[...] = jnp.zeros((P, HW + 2 * PAD), jnp.float32)
        buf_ref[:, PAD:PAD + HW] = x_ref[...].astype(jnp.float32)

        # Column index of every flat position (only needed for horizontal edge masking).
        lane = jax.lax.broadcasted_iota(jnp.int32, (P, HW), 1)
        col = (lane & (W - 1)) if (W & (W - 1)) == 0 else (lane % W)

        # ---- horizontal 1-D pass: lane shifts via static slices of the padded buffer.
        acc = jnp.zeros((P, HW), jnp.float32)
        for kj in range(K):
            d = kj - p
            term = buf_ref[:, PAD + d:PAD + d + HW]
            if d > 0:                        # reads column c+d -> invalid at the right edge
                term = jnp.where(col < (W - d), term, 0.0)
            elif d < 0:                      # invalid at the left edge
                term = jnp.where(col >= (-d), term, 0.0)
            acc = acc + w1d[kj] * term       # scalar-constant * vector (no broadcasts)

        # ---- vertical 1-D pass: whole-row shifts; zero pad rows supply 'same' padding.
        buf_ref[:, PAD:PAD + HW] = acc       # pad rows untouched -> still zero
        out = jnp.zeros((P, HW), jnp.float32)
        for ki in range(K):
            d = ki - p
            out = out + w1d[ki] * buf_ref[:, PAD + d * W:PAD + d * W + HW]

        o_ref[...] = out.astype(o_ref.dtype)  # (P, HW): lane-dense, unmasked stores

    out_flat = pl.pallas_call(
        kernel,
        out_shape=jax.ShapeDtypeStruct((P, HW), x.dtype),
        scratch_shapes=[pltpu.VMEM((P, HW + 2 * PAD), jnp.float32)],
    )(x_flat)
    return out_flat.reshape(N, C, H, W)


def gaussian_blur_reference(x: jnp.ndarray, weight: jnp.ndarray) -> jnp.ndarray:
    """Pure-JAX reference (lax depthwise conv with the module's 2-D weight)."""
    C = x.shape[1]
    K = weight.shape[-1]
    p = (K - 1) // 2
    return jax.lax.conv_general_dilated(
        x, weight,
        window_strides=(1, 1),
        padding=[(p, p), (p, p)],
        dimension_numbers=("NCHW", "OIHW", "NCHW"),
        feature_group_count=C,
        precision=jax.lax.Precision.HIGHEST,
    )


if __name__ == "__main__":
    # groups=3 is hardcoded in the PyTorch forward, so channels must be 3.
    batch, channels, spatial = 2, 3, 16
    kernel_size, sigma = 5, 1.0

    key = jax.random.PRNGKey(0)
    x = jax.random.normal(key, (batch, channels, spatial, spatial), dtype=jnp.float32)

    out = jax.block_until_ready(gaussian_blur_pallas(x, kernel_size, sigma))

    weight = _gaussian_kernel_2d(kernel_size, sigma, channels)
    ref = jax.block_until_ready(gaussian_blur_reference(x, weight))

    assert out.shape == (batch, channels, spatial, spatial)
    assert jnp.allclose(out, ref, atol=1e-5, rtol=1e-5), "mismatch vs reference"

    print("KERNEL_OK")
</pallas_src>

<mosaic_0001>
module attributes {stable_mosaic.version = 11 : i64} {
  func.func @kernel(%arg0: memref<6x256xf32, #tpu.memory_space<vmem>>, %arg1: memref<6x256xf32, #tpu.memory_space<vmem>>, %arg2: memref<6x320xf32, #tpu.memory_space<vmem>>) attributes {dimension_semantics = [], scalar_prefetch = 0 : i64, scratch_operands = 1 : i64, tpu.core_type = #tpu.core_type<tc>} {
    %cst = arith.constant 0.000000e+00 : f32
    %0 = vector.broadcast %cst : f32 to vector<6x320xf32>
    %c0 = arith.constant 0 : index
    %c0_0 = arith.constant 0 : index
    %1 = vector.load %arg2[%c0, %c0_0] : memref<6x320xf32, #tpu.memory_space<vmem>>, vector<6x320xf32>
    tpu.vector_store %arg2[%c0, %c0_0], %0 {strides = array<i32>} : memref<6x320xf32, #tpu.memory_space<vmem>>, vector<6x320xf32>,
    %c0_1 = arith.constant 0 : index
    %c0_2 = arith.constant 0 : index
    %2 = vector.load %arg0[%c0_1, %c0_2] : memref<6x256xf32, #tpu.memory_space<vmem>>, vector<6x256xf32>
    %c0_3 = arith.constant 0 : index
    %c32 = arith.constant 32 : index
    %3 = vector.load %arg2[%c0_3, %c32] : memref<6x320xf32, #tpu.memory_space<vmem>>, vector<6x256xf32>
    tpu.vector_store %arg2[%c0_3, %c32], %2 {strides = array<i32>} : memref<6x320xf32, #tpu.memory_space<vmem>>, vector<6x256xf32>,
    %4 = tpu.iota {dimensions = array<i32: 1>} : vector<6x256xi32>
    %c15_i32 = arith.constant 15 : i32
    %5 = vector.broadcast %c15_i32 : i32 to vector<6x256xi32>
    %6 = arith.andi %4, %5 : vector<6x256xi32>
    %cst_4 = arith.constant 0.000000e+00 : f32
    %7 = vector.broadcast %cst_4 : f32 to vector<6x256xf32>
    %c0_5 = arith.constant 0 : index
    %c30 = arith.constant 30 : index
    %8 = vector.load %arg2[%c0_5, %c30] : memref<6x320xf32, #tpu.memory_space<vmem>>, vector<6x256xf32>
    %c2_i32 = arith.constant 2 : i32
    %9 = vector.broadcast %c2_i32 : i32 to vector<6x256xi32>
    %10 = arith.cmpi sge, %6, %9 : vector<6x256xi32>
    %cst_6 = arith.constant 0.000000e+00 : f32
    %11 = vector.broadcast %cst_6 : f32 to vector<6x256xf32>
    %12 = arith.select %10, %8, %11 : vector<6x256xi1>, vector<6x256xf32>
    %cst_7 = arith.constant 0.054488685 : f32
    %13 = vector.broadcast %cst_7 : f32 to vector<6x256xf32>
    %14 = arith.mulf %13, %12 : vector<6x256xf32>
    %15 = arith.addf %7, %14 : vector<6x256xf32>
    %c0_8 = arith.constant 0 : index
    %c31 = arith.constant 31 : index
    %16 = vector.load %arg2[%c0_8, %c31] : memref<6x320xf32, #tpu.memory_space<vmem>>, vector<6x256xf32>
    %c1_i32 = arith.constant 1 : i32
    %17 = vector.broadcast %c1_i32 : i32 to vector<6x256xi32>
    %18 = arith.cmpi sge, %6, %17 : vector<6x256xi32>
    %cst_9 = arith.constant 0.000000e+00 : f32
    %19 = vector.broadcast %cst_9 : f32 to vector<6x256xf32>
    %20 = arith.select %18, %16, %19 : vector<6x256xi1>, vector<6x256xf32>
    %cst_10 = arith.constant 0.244201347 : f32
    %21 = vector.broadcast %cst_10 : f32 to vector<6x256xf32>
    %22 = arith.mulf %21, %20 : vector<6x256xf32>
    %23 = arith.addf %15, %22 : vector<6x256xf32>
    %c0_11 = arith.constant 0 : index
    %c32_12 = arith.constant 32 : index
    %24 = vector.load %arg2[%c0_11, %c32_12] : memref<6x320xf32, #tpu.memory_space<vmem>>, vector<6x256xf32>
    %cst_13 = arith.constant 0.402619958 : f32
    %25 = vector.broadcast %cst_13 : f32 to vector<6x256xf32>
    %26 = arith.mulf %25, %24 : vector<6x256xf32>
    %27 = arith.addf %23, %26 : vector<6x256xf32>
    %c0_14 = arith.constant 0 : index
    %c33 = arith.constant 33 : index
    %28 = vector.load %arg2[%c0_14, %c33] : memref<6x320xf32, #tpu.memory_space<vmem>>, vector<6x256xf32>
    %c15_i32_15 = arith.constant 15 : i32
    %29 = vector.broadcast %c15_i32_15 : i32 to vector<6x256xi32>
    %30 = arith.cmpi slt, %6, %29 : vector<6x256xi32>
    %cst_16 = arith.constant 0.000000e+00 : f32
    %31 = vector.broadcast %cst_16 : f32 to vector<6x256xf32>
    %32 = arith.select %30, %28, %31 : vector<6x256xi1>, vector<6x256xf32>
    %cst_17 = arith.constant 0.244201347 : f32
    %33 = vector.broadcast %cst_17 : f32 to vector<6x256xf32>
    %34 = arith.mulf %33, %32 : vector<6x256xf32>
    %35 = arith.addf %27, %34 : vector<6x256xf32>
    %c0_18 = arith.constant 0 : index
    %c34 = arith.constant 34 : index
    %36 = vector.load %arg2[%c0_18, %c34] : memref<6x320xf32, #tpu.memory_space<vmem>>, vector<6x256xf32>
    %c14_i32 = arith.constant 14 : i32
    %37 = vector.broadcast %c14_i32 : i32 to vector<6x256xi32>
    %38 = arith.cmpi slt, %6, %37 : vector<6x256xi32>
    %cst_19 = arith.constant 0.000000e+00 : f32
    %39 = vector.broadcast %cst_19 : f32 to vector<6x256xf32>
    %40 = arith.select %38, %36, %39 : vector<6x256xi1>, vector<6x256xf32>
    %cst_20 = arith.constant 0.054488685 : f32
    %41 = vector.broadcast %cst_20 : f32 to vector<6x256xf32>
    %42 = arith.mulf %41, %40 : vector<6x256xf32>
    %43 = arith.addf %35, %42 : vector<6x256xf32>
    %c0_21 = arith.constant 0 : index
    %c32_22 = arith.constant 32 : index
    %44 = vector.load %arg2[%c0_21, %c32_22] : memref<6x320xf32, #tpu.memory_space<vmem>>, vector<6x256xf32>
    tpu.vector_store %arg2[%c0_21, %c32_22], %43 {strides = array<i32>} : memref<6x320xf32, #tpu.memory_space<vmem>>, vector<6x256xf32>,
    %cst_23 = arith.constant 0.000000e+00 : f32
    %45 = vector.broadcast %cst_23 : f32 to vector<6x256xf32>
    %c0_24 = arith.constant 0 : index
    %c0_25 = arith.constant 0 : index
    %46 = vector.load %arg2[%c0_24, %c0_25] : memref<6x320xf32, #tpu.memory_space<vmem>>, vector<6x256xf32>
    %cst_26 = arith.constant 0.054488685 : f32
    %47 = vector.broadcast %cst_26 : f32 to vector<6x256xf32>
    %48 = arith.mulf %47, %46 : vector<6x256xf32>
    %49 = arith.addf %45, %48 : vector<6x256xf32>
    %c0_27 = arith.constant 0 : index
    %c16 = arith.constant 16 : index
    %50 = vector.load %arg2[%c0_27, %c16] : memref<6x320xf32, #tpu.memory_space<vmem>>, vector<6x256xf32>
    %cst_28 = arith.constant 0.244201347 : f32
    %51 = vector.broadcast %cst_28 : f32 to vector<6x256xf32>
    %52 = arith.mulf %51, %50 : vector<6x256xf32>
    %53 = arith.addf %49, %52 : vector<6x256xf32>
    %c0_29 = arith.constant 0 : index
    %c32_30 = arith.constant 32 : index
    %54 = vector.load %arg2[%c0_29, %c32_30] : memref<6x320xf32, #tpu.memory_space<vmem>>, vector<6x256xf32>
    %cst_31 = arith.constant 0.402619958 : f32
    %55 = vector.broadcast %cst_31 : f32 to vector<6x256xf32>
    %56 = arith.mulf %55, %54 : vector<6x256xf32>
    %57 = arith.addf %53, %56 : vector<6x256xf32>
    %c0_32 = arith.constant 0 : index
    %c48 = arith.constant 48 : index
    %58 = vector.load %arg2[%c0_32, %c48] : memref<6x320xf32, #tpu.memory_space<vmem>>, vector<6x256xf32>
    %cst_33 = arith.constant 0.244201347 : f32
    %59 = vector.broadcast %cst_33 : f32 to vector<6x256xf32>
    %60 = arith.mulf %59, %58 : vector<6x256xf32>
    %61 = arith.addf %57, %60 : vector<6x256xf32>
    %c0_34 = arith.constant 0 : index
    %c64 = arith.constant 64 : index
    %62 = vector.load %arg2[%c0_34, %c64] : memref<6x320xf32, #tpu.memory_space<vmem>>, vector<6x256xf32>
    %cst_35 = arith.constant 0.054488685 : f32
    %63 = vector.broadcast %cst_35 : f32 to vector<6x256xf32>
    %64 = arith.mulf %63, %62 : vector<6x256xf32>
    %65 = arith.addf %61, %64 : vector<6x256xf32>
    %c0_36 = arith.constant 0 : index
    %c0_37 = arith.constant 0 : index
    %66 = vector.load %arg1[%c0_36, %c0_37] : memref<6x256xf32, #tpu.memory_space<vmem>>, vector<6x256xf32>
    tpu.vector_store %arg1[%c0_36, %c0_37], %65 {strides = array<i32>} : memref<6x256xf32, #tpu.memory_space<vmem>>, vector<6x256xf32>,
    return
  }
}

</mosaic_0001>

<bundles_post_ra>
// kernel: tpu_custom_call.1
= control target key start
LH: loop header
LB: loop body
LE: loop exit
PB: predicated region body
PF: predicated region fallthrough
CT: control target
= control target key end

     0   :  { %6 = vsyncpa [#allocation4], 0  ;;  %s381_s0 = inlined_call_operand.hbm [shape: f32[6,256], index: 0, kind: input, shape index: {}]   ;;  %s382_s1 = inlined_call_operand.hbm [shape: f32[6,256], index: 1, kind: output, shape index: {}]  }
   0x1   :  { %7 = vsyncpa [#allocation5], 0  ;;  %s313_s6 = smov [#allocation3]   ;;  %s265_s10 = scalar_lea.hbm %s381_s0, 256 }
   0x2   :  { %s14_s7 = sshll.u32 %s313_s6, 4  ;;  %p266_p0 = scmp.ne.s32.totalorder %s381_s0, %s265_s10  ;;  %s15_s7 = int_to_ptr.vmem [resolvable:$true] %s14_s7 }
   0x3   :  { %p269_p1 = scmp.lt.u32.totalorder %s265_s10, %s381_s0 }
   0x5   :  { %p271_p2 = pnand %p269_p1, %p266_p0 }
   0x7   :  { %274 = shalt.err (!%p271_p2)
}
   0x8   :  { %s275_s15 = scalar_lea.vmem %s15_s7, 256  ;;  %p280_p4 = scmp.lt.s32.totalorder %s15_s7, %s15_s7 }
   0x9   :  { %p276_p3 = scmp.ne.s32.totalorder %s15_s7, %s275_s15  ;;  %p281_p5 = scmp.lt.s32.totalorder %s275_s15, %s275_s15 }
   0xb   :  { %p282_p6 = por %p281_p5, %p280_p4 }
   0xd   :  { %p283_p7 = pnand %p282_p6, %p276_p3 }
   0xf   :  { %286 = shalt.err (!%p283_p7)
}
  0x10   :  { %17 = dma.hbm_to_vmem [thread:$0]  %s381_s0, 256, %s15_s7, [#allocation4]  }
  0x11   :  { %309 = dma.done.wait [#allocation4], 256  }
  0x12   :  { %310 = vsyncadd [#allocation4], 4294967040  ;;  %vm23_vm0 = vcmask 521216   ;;  %v314_v0 = vmov 0.0   ;;  %v25_v1 = vld [vmem:[#allocation3] sm:$0x3f]  ;;  %v43_v13 = vlaneseq }
  0x13   :  { %21 = vst [vmem:[#allocation2] sm:$0x3f] %v314_v0  ;;  %22 = vst [vmem:[#allocation2 + $0x8] sm:$0x3f] %v314_v0  ;;  %s315_s18 = smov 32   ;;  %vm38_vm1 = vcmask 1045760  }
  0x14   :  { %24 = vst.msk [vmem:[#allocation2 + $0x10] sm:$0x3f] %vm23_vm0, %v314_v0  ;;  %29 = vrot.lane.b32.xlu0 %v25_v1, %s315_s18  ;;  %v26_v2 = vld [vmem:[#allocation3 + $0x8] sm:$0x3f]  ;;  %vm33_vm2 = vcmask 261120   ;;  %vm41_vm3 = vcmask 259072  }
  0x15   :  { %s316_s0 = smov 98   ;;  %s317_s19 = smov 97   ;;  %v44_v16 = vand.u32 127, %v43_v13  ;;  %vm62_vm4 = vcmask 801792   ;;  %vm81_vm7 = vcmask 793600   ;;  %vm119_vm11 = vcmask 777216  }
  0x16   :  { %s318_s20 = smov 95   ;;  %s319_s21 = smov 94   ;;  %vm104_vm13 = vcmask 785408   ;;  %vm138_vm14 = vcmask 769024  }
  0x17   :  { %s320_s22 = smov 96   ;;  %v45_v19 = vadd.s32 128, %v44_v16  ;;  %v46_v21 = vand.u32 15, %v44_v16  ;;  %s321_s23 = smov 112  }
  0x18   :  { %31 = vrot.lane.b32.xlu0 %v26_v2, %s315_s18  ;;  %s322_s24 = smov 80   ;;  %s323_s25 = smov 64  }
  0x19   :  { %v47_v22 = vand.u32 15, %v45_v19  ;;  %vm51_vm5 = vcmp.ge.s32.totalorder %v46_v21, 2  ;;  %vm73_vm8 = vcmp.ge.s32.totalorder %v46_v21, 1  ;;  %vm111_vm10 = vcmp.lt.s32.totalorder %v46_v21, 15  ;;  %s324_s26 = smov [#allocation6]  }
  0x1a   :  { %vm130_vm15 = vcmp.lt.s32.totalorder %v46_v21, 14  ;;  %s244_s27 = sshll.u32 %s324_s26, 4  ;;  %s245_s27 = int_to_ptr.vmem [resolvable:$true] %s244_s27 }
  0x1b   :  { %vm52_vm6 = vcmp.ge.s32.totalorder %v47_v22, 2  ;;  %vm74_vm9 = vcmp.ge.s32.totalorder %v47_v22, 1  ;;  %vm112_vm12 = vcmp.lt.s32.totalorder %v47_v22, 15  ;;  %vm131_vm0 = vcmp.lt.s32.totalorder %v47_v22, 14  ;;  %s287_s28 = scalar_lea.vmem %s245_s27, 256  ;;  %p292_p9 = scmp.lt.s32.totalorder %s245_s27, %s245_s27 }
  0x1c   :  { %p288_p8 = scmp.ne.s32.totalorder %s245_s27, %s287_s28  ;;  %p293_p10 = scmp.lt.s32.totalorder %s287_s28, %s287_s28 }
  0x1e   :  { %p294_p11 = por %p293_p10, %p292_p9 }
  0x20   :  { %p295_p12 = pnand %p294_p11, %p288_p8 }
  0x86   :  { %v30_v3 = vpop.permute.xlu0 %29 }
  0x87   :  { %39 = vst.msk [vmem:[#allocation2] sm:$0x3f] %vm38_vm1, %v30_v3 }
  0x8a   :  { %v32_v4 = vpop.permute.xlu0 %31 }
  0x8b   :  { %v34_v5 = vsel %vm33_vm2, %v30_v3, %v32_v4  ;;  %42 = vst.msk [vmem:[#allocation2 + $0x10] sm:$0x3f] %vm41_vm3, %v32_v4 }
  0x8c   :  { %40 = vst [vmem:[#allocation2 + $0x8] sm:$0x3f] %v34_v5 }
  0x8e   :  { %v48_v6 = vld [vmem:[#allocation2] sm:$0x3f] }
  0x8f   :  { %56 = vrot.lane.b32.xlu1 %v48_v6, %s316_s0  ;;  %v92_v9 = vmul.f32 0.40261996, %v48_v6 }
  0x92   :  { %v50_v7 = vld [vmem:[#allocation2 + $0x10] sm:$0x3f] }
  0x93   :  { %60 = vrot.lane.b32.xlu0 %v50_v7, %s316_s0  ;;  %75 = vrot.lane.b32.xlu1 %v48_v6, %s317_s19  ;;  %v49_v8 = vld [vmem:[#allocation2 + $0x8] sm:$0x3f]  ;;  %v94_v11 = vmul.f32 0.40261996, %v50_v7 }
  0x94   :  { %v93_v10 = vmul.f32 0.40261996, %v49_v8 }
  0x97   :  { %113 = vrot.lane.b32.xlu0 %v48_v6, %s318_s20  ;;  %79 = vrot.lane.b32.xlu1 %v50_v7, %s317_s19 }
  0x9b   :  { %117 = vrot.lane.b32.xlu0 %v50_v7, %s318_s20  ;;  %58 = vrot.lane.b32.xlu1 %v49_v8, %s316_s0 }
  0x9f   :  { %132 = vrot.lane.b32.xlu0 %v48_v6, %s319_s21  ;;  %115 = vrot.lane.b32.xlu1 %v49_v8, %s318_s20 }
  0xa3   :  { %77 = vrot.lane.b32.xlu0 %v49_v8, %s317_s19  ;;  %98 = vrot.lane.b32.xlu1 %v92_v9, %s320_s22 }
  0xa7   :  { %100 = vrot.lane.b32.xlu0 %v93_v10, %s320_s22  ;;  %102 = vrot.lane.b32.xlu1 %v94_v11, %s320_s22 }
  0xab   :  { %136 = vrot.lane.b32.xlu0 %v50_v7, %s319_s21  ;;  %134 = vrot.lane.b32.xlu1 %v49_v8, %s319_s21 }
 0x101   :  { %v57_v12 = vpop.permute.xlu1 %56 }
 0x105   :  { %v61_v14 = vpop.permute.xlu0 %60  ;;  %v76_v15 = vpop.permute.xlu1 %75 }
 0x109   :  { %v114_v17 = vpop.permute.xlu0 %113  ;;  %v80_v18 = vpop.permute.xlu1 %79 }
 0x10d   :  { %v118_v20 = vpop.permute.xlu0 %117  ;;  %v59_v23 = vpop.permute.xlu1 %58 }
 0x10e   :  { %v63_v24 = vsel %vm62_vm4, %v57_v12, %v59_v23  ;;  %v64_v25 = vsel %vm62_vm4, %v59_v23, %v61_v14 }
 0x10f   :  { %v67_v28 = vsel %vm51_vm5, %v63_v24, 0.0  ;;  %v68_v29 = vsel %vm52_vm6, %v64_v25, 0.0 }
 0x110   :  { %v69_v34 = vmul.f32 0.054488685, %v67_v28  ;;  %v70_v35 = vmul.f32 0.054488685, %v68_v29 }
 0x111   :  { %v133_v26 = vpop.permute.xlu0 %132  ;;  %v116_v27 = vpop.permute.xlu1 %115 }
 0x112   :  { %v120_v38 = vsel %vm119_vm11, %v114_v17, %v116_v27  ;;  %v121_v39 = vsel %vm119_vm11, %v116_v27, %v118_v20 }
 0x113   :  { %v124_v48 = vsel %vm111_vm10, %v120_v38, 0.0  ;;  %v125_v49 = vsel %vm112_vm12, %v121_v39, 0.0 }
 0x114   :  { %v126_v54 = vmul.f32 0.24420135, %v124_v48  ;;  %v127_v55 = vmul.f32 0.24420135, %v125_v49 }
 0x115   :  { %v78_v30 = vpop.permute.xlu0 %77  ;;  %v99_v31 = vpop.permute.xlu1 %98 }
 0x116   :  { %v82_v32 = vsel %vm81_vm7, %v76_v15, %v78_v30  ;;  %v83_v33 = vsel %vm81_vm7, %v78_v30, %v80_v18 }
 0x117   :  { %v86_v36 = vsel %vm73_vm8, %v82_v32, 0.0  ;;  %v87_v37 = vsel %vm74_vm9, %v83_v33, 0.0 }
 0x118   :  { %v88_v40 = vmul.f32 0.24420135, %v86_v36  ;;  %v89_v41 = vmul.f32 0.24420135, %v87_v37 }
 0x119   :  { %v101_v42 = vpop.permute.xlu0 %100  ;;  %v103_v43 = vpop.permute.xlu1 %102 }
 0x11a   :  { %v90_v44 = vadd.f32 %v88_v40, %v69_v34  ;;  %v105_v45 = vsel %vm104_vm13, %v99_v31, %v101_v42  ;;  %v91_v46 = vadd.f32 %v89_v41, %v70_v35  ;;  %v106_v47 = vsel %vm104_vm13, %v101_v42, %v103_v43 }
 0x11c   :  { %v109_v50 = vadd.f32 %v105_v45, %v90_v44  ;;  %v110_v51 = vadd.f32 %v106_v47, %v91_v46 }
 0x11d   :  { %v137_v52 = vpop.permute.xlu0 %136  ;;  %v135_v53 = vpop.permute.xlu1 %134 }
 0x11e   :  { %v139_v56 = vsel %vm138_vm14, %v133_v26, %v135_v53  ;;  %v140_v57 = vsel %vm138_vm14, %v135_v53, %v137_v52  ;;  %v128_v60 = vadd.f32 %v126_v54, %v109_v50  ;;  %v129_v61 = vadd.f32 %v127_v55, %v110_v51 }
 0x11f   :  { %v143_v58 = vsel %vm130_vm15, %v139_v56, 0.0  ;;  %v144_v59 = vsel %vm131_vm0, %v140_v57, 0.0 }
 0x120   :  { %v145_v62 = vmul.f32 0.054488685, %v143_v58  ;;  %v146_v63 = vmul.f32 0.054488685, %v144_v59 }
 0x122   :  { %v148_v0 = vadd.f32 %v146_v63, %v129_v61  ;;  %v147_v1 = vadd.f32 %v145_v62, %v128_v60 }
 0x124   :  { %153 = vrot.lane.b32.xlu0 %v148_v0, %s315_s18  ;;  %151 = vrot.lane.b32.xlu1 %v147_v1, %s315_s18 }
 0x196   :  { %v154_v2 = vpop.permute.xlu0 %153  ;;  %v152_v3 = vpop.permute.xlu1 %151 }
 0x197   :  { %161 = vst.msk [vmem:[#allocation2 + $0x10] sm:$0x3f] %vm41_vm3, %v154_v2  ;;  %v155_v4 = vsel %vm33_vm2, %v152_v3, %v154_v2  ;;  %vm212_vm2 = vcmask 654336   ;;  %vm229_vm3 = vcmask 523264  }
 0x198   :  { %159 = vst.msk [vmem:[#allocation2] sm:$0x3f] %vm38_vm1, %v152_v3  ;;  %160 = vst [vmem:[#allocation2 + $0x8] sm:$0x3f] %v155_v4  ;;  %vm181_vm1 = vcmask 916480  }
 0x19e   :  { %v168_v8 = vld [vmem:[#allocation2 + $0x10] sm:$0x3f] }
 0x19f   :  { %v162_v5 = vld [vmem:[#allocation2] sm:$0x3f]  ;;  %v190_v9 = vmul.f32 0.40261996, %v168_v8  ;;  %v171_v10 = vmul.f32 0.24420135, %v168_v8 }
 0x1a0   :  { %v188_v6 = vmul.f32 0.40261996, %v162_v5  ;;  %v169_v7 = vmul.f32 0.24420135, %v162_v5  ;;  %v164_v11 = vmul.f32 0.054488685, %v162_v5 }
 0x1a1   :  { %v163_v12 = vld [vmem:[#allocation2 + $0x8] sm:$0x3f]  ;;  %v219_v15 = vmul.f32 0.054488685, %v168_v8 }
 0x1a2   :  { %194 = vrot.lane.b32.xlu0 %v188_v6, %s320_s22  ;;  %175 = vrot.lane.b32.xlu1 %v169_v7, %s321_s23  ;;  %v170_v13 = vmul.f32 0.24420135, %v163_v12  ;;  %v189_v14 = vmul.f32 0.40261996, %v163_v12  ;;  %v165_v16 = vmul.f32 0.054488685, %v163_v12 }
 0x1a6   :  { %198 = vrot.lane.b32.xlu0 %v190_v9, %s320_s22  ;;  %179 = vrot.lane.b32.xlu1 %v171_v10, %s321_s23 }
 0x1aa   :  { %206 = vrot.lane.b32.xlu1 %v169_v7, %s322_s24  ;;  %223 = vrot.lane.b32.xlu0 %v164_v11, %s323_s25 }
 0x1ae   :  { %210 = vrot.lane.b32.xlu1 %v171_v10, %s322_s24  ;;  %177 = vrot.lane.b32.xlu0 %v170_v13, %s321_s23 }
 0x1b2   :  { %196 = vrot.lane.b32.xlu1 %v189_v14, %s320_s22  ;;  %208 = vrot.lane.b32.xlu0 %v170_v13, %s322_s24 }
 0x1b6   :  { %227 = vrot.lane.b32.xlu0 %v219_v15, %s323_s25  ;;  %225 = vrot.lane.b32.xlu1 %v165_v16, %s323_s25 }
 0x214   :  { %v195_v17 = vpop.permute.xlu0 %194  ;;  %v176_v18 = vpop.permute.xlu1 %175 }
 0x218   :  { %v199_v19 = vpop.permute.xlu0 %198  ;;  %v180_v20 = vpop.permute.xlu1 %179 }
 0x21c   :  { %v207_v21 = vpop.permute.xlu1 %206  ;;  %v224_v22 = vpop.permute.xlu0 %223 }
 0x220   :  { %v211_v23 = vpop.permute.xlu1 %210  ;;  %v178_v24 = vpop.permute.xlu0 %177 }
 0x221   :  { %v182_v25 = vsel %vm181_vm1, %v176_v18, %v178_v24  ;;  %v183_v26 = vsel %vm181_vm1, %v178_v24, %v180_v20 }
 0x222   :  { %v186_v27 = vadd.f32 %v182_v25, %v164_v11  ;;  %v187_v28 = vadd.f32 %v183_v26, %v165_v16 }
 0x224   :  { %v197_v29 = vpop.permute.xlu1 %196  ;;  %v209_v30 = vpop.permute.xlu0 %208 }
 0x225   :  { %v200_v31 = vsel %vm104_vm13, %v195_v17, %v197_v29  ;;  %v201_v32 = vsel %vm104_vm13, %v197_v29, %v199_v19  ;;  %v213_v35 = vsel %vm212_vm2, %v207_v21, %v209_v30  ;;  %v214_v36 = vsel %vm212_vm2, %v209_v30, %v211_v23 }
 0x226   :  { %v204_v33 = vadd.f32 %v200_v31, %v186_v27  ;;  %v205_v34 = vadd.f32 %v201_v32, %v187_v28 }
 0x228   :  { %v217_v37 = vadd.f32 %v213_v35, %v204_v33  ;;  %v218_v38 = vadd.f32 %v214_v36, %v205_v34  ;;  %v228_v39 = vpop.permute.xlu0 %227  ;;  %v226_v40 = vpop.permute.xlu1 %225 }
 0x229   :  { %v230_v41 = vsel %vm229_vm3, %v224_v22, %v226_v40  ;;  %v231_v42 = vsel %vm229_vm3, %v226_v40, %v228_v39 }
 0x22a   :  { %v234_v43 = vadd.f32 %v230_v41, %v217_v37  ;;  %v235_v44 = vadd.f32 %v231_v42, %v218_v38 }
 0x22c   :  { %236 = vst [vmem:[#allocation6] sm:$0x3f] %v234_v43  ;;  %237 = vst [vmem:[#allocation6 + $0x8] sm:$0x3f] %v235_v44 }
 0x22d   :  { %298 = shalt.err (!%p295_p12)
}
 0x22e   :  { %s299_s2 = scalar_lea.hbm %s382_s1, 256 }
 0x22f   :  { %p300_p13 = scmp.ne.s32.totalorder %s382_s1, %s299_s2  ;;  %p303_p0 = scmp.lt.u32.totalorder %s299_s2, %s382_s1 }
 0x231   :  { %p305_p1 = pnand %p303_p0, %p300_p13 }
 0x233   :  { %308 = shalt.err (!%p305_p1)
}
 0x234   :  { %247 = dma.vmem_to_hbm [thread:$0]  %s245_s27, 256, %s382_s1, [#allocation5]  }
 0x235   :  { %311 = dma.done.wait [#allocation5], 256  }
 0x236   :  { %312 = vsyncadd [#allocation5], 4294967040 }
 0x237   :  { %251 = vsyncpa [#allocation4], 1 }
 0x238   :  { %252 = vsyncpa [#allocation5], 1 }

</bundles_post_ra>
